<compile_context>
chip_gen: v5e
topology: v5e:2x2
jax: 0.10.0
libtpu: 0.0.40
codegen_flags: <defaults>
</compile_context>

<pallas_src>
import jax
import jax.numpy as jnp
from jax.experimental import pallas as pl
from jax.experimental.pallas import tpu as pltpu


def _snake_mlp_kernel(x_ref, w1_ref, b1_ref, w2_ref, b2_ref, w3_ref, b3_ref,
                      out_ref):
    # x: (8, TILE_B) f32, batch on the lane axis.
    x = x_ref[...]

    # hidden1: (64, 8) @ (8, TB) + (64, 1) -> ReLU
    h1 = jnp.dot(w1_ref[...], x, preferred_element_type=jnp.float32)
    h1 = jnp.maximum(h1 + b1_ref[...], 0.0)

    # hidden2: (16, 64) @ (64, TB) + (16, 1) -> ReLU
    h2 = jnp.dot(w2_ref[...], h1, preferred_element_type=jnp.float32)
    h2 = jnp.maximum(h2 + b2_ref[...], 0.0)

    # output: (4, 16) @ (16, TB) + (4, 1) -> Softmax over the class axis
    # (class axis is axis 0 in this transposed layout).
    logits = jnp.dot(w3_ref[...], h2, preferred_element_type=jnp.float32)
    logits = logits + b3_ref[...]

    m = jnp.max(logits, axis=0, keepdims=True)            # 4-sublane reduce (XLU)
    e = jnp.exp(logits - m)                                # EUP
    denom = jnp.sum(e, axis=0, keepdims=True)
    # EUP reciprocal: the divide leaves the VALU slot; negligible accuracy
    # impact on a 4-way softmax.
    out_ref[...] = (e * pl.reciprocal(denom, approx=True)).astype(out_ref.dtype)


def snake_forward(x, params, *, block_b=4096):
    """x: (B, 8) float32. params: w1 (64,8), b1 (64,1), w2 (16,64), b2 (16,1),
    w3 (4,16), b3 (4,1). Returns softmax probabilities of shape (B, 4)."""
    B = x.shape[0]
    xt = x.T.astype(jnp.float32)                       # (8, B) — batch on lanes

    # Pad batch to a lane-aligned multiple of the tile so block shapes are
    # (.., multiple of 128). Padded columns cost nothing and are sliced off.
    lane = 128
    padded = max(lane, pl.cdiv(B, lane) * lane)
    tile = min(block_b, padded)
    padded = pl.cdiv(padded, tile) * tile
    if padded != B:
        xt = jnp.pad(xt, ((0, 0), (0, padded - B)))

    grid = (padded // tile,)
    const = lambda i: (0, 0)   # weights/biases: one resident block for all steps

    out_t = pl.pallas_call(
        _snake_mlp_kernel,
        out_shape=jax.ShapeDtypeStruct((4, padded), jnp.float32),
        grid=grid,
        in_specs=[
            pl.BlockSpec((8, tile), lambda i: (0, i)),   # x, streamed per step
            pl.BlockSpec((64, 8), const),                # w1 (resident)
            pl.BlockSpec((64, 1), const),                # b1
            pl.BlockSpec((16, 64), const),               # w2
            pl.BlockSpec((16, 1), const),                # b2
            pl.BlockSpec((4, 16), const),                # w3
            pl.BlockSpec((4, 1), const),                 # b3
        ],
        out_specs=pl.BlockSpec((4, tile), lambda i: (0, i)),
        compiler_params=pltpu.CompilerParams(
            # Batch axis is embarrassingly parallel -> shards over both TCs
            # on v7x; harmless on single-TC v5e/v6e.
            dimension_semantics=("parallel",),
            # Per-step working set (double-buffered x/out + h1/h2 + weights)
            # is ~3 MiB at tile=4096; 32 MiB leaves ample headroom on all of
            # v5e / v6e / v7x.
            vmem_limit_bytes=32 * 1024 * 1024,
        ),
    )(xt, params["w1"], params["b1"], params["w2"], params["b2"],
      params["w3"], params["b3"])

    return out_t[:, :B].T                               # back to (B, 4)


def snake_reference(x, params):
    """Pure-JAX reference matching the PyTorch forward."""
    h1 = jax.nn.relu(x @ params["w1"].T + params["b1"].T)
    h2 = jax.nn.relu(h1 @ params["w2"].T + params["b2"].T)
    logits = h2 @ params["w3"].T + params["b3"].T
    return jax.nn.softmax(logits, axis=-1)


def init_params(key):
    """PyTorch nn.Linear default init (U(-k, k), k=1/sqrt(fan_in)); weights
    stored in torch's (out_features, in_features) layout, biases as (out, 1)."""
    def linear(key, fan_in, fan_out):
        kw, kb = jax.random.split(key)
        bound = 1.0 / jnp.sqrt(jnp.float32(fan_in))
        w = jax.random.uniform(kw, (fan_out, fan_in), jnp.float32,
                               minval=-bound, maxval=bound)
        b = jax.random.uniform(kb, (fan_out, 1), jnp.float32,
                               minval=-bound, maxval=bound)
        return w, b

    k1, k2, k3 = jax.random.split(key, 3)
    w1, b1 = linear(k1, 8, 64)
    w2, b2 = linear(k2, 64, 16)
    w3, b3 = linear(k3, 16, 4)
    return {"w1": w1, "b1": b1, "w2": w2, "b2": b2, "w3": w3, "b3": b3}


if __name__ == "__main__":
    key = jax.random.PRNGKey(0)
    k_params, k_x = jax.random.split(key)

    params = init_params(k_params)

    # Small example consistent with the module: batch=2, 8 input features.
    x = jax.random.normal(k_x, (2, 8), jnp.float32)
    out = jax.block_until_ready(snake_forward(x, params))
    ref = snake_reference(x, params)

    assert out.shape == (2, 4)
    assert jnp.allclose(jnp.sum(out, axis=-1), 1.0, atol=5e-3)
    assert jnp.allclose(out, ref, atol=5e-3)

    # Larger batch to exercise the pipelined grid (2 steps at tile=4096).
    xb = jax.random.normal(jax.random.PRNGKey(1), (8192, 8), jnp.float32)
    outb = jax.block_until_ready(snake_forward(xb, params))
    refb = snake_reference(xb, params)
    assert outb.shape == (8192, 4)
    assert jnp.allclose(outb, refb, atol=5e-3)

    print("KERNEL_OK")
</pallas_src>

<mosaic_0001>
module attributes {stable_mosaic.version = 11 : i64} {
  func.func @_snake_mlp_kernel(%arg0: i32, %arg1: memref<8x128xf32, #tpu.memory_space<vmem>>, %arg2: memref<64x8xf32, #tpu.memory_space<vmem>>, %arg3: memref<64x1xf32, #tpu.memory_space<vmem>>, %arg4: memref<16x64xf32, #tpu.memory_space<vmem>>, %arg5: memref<16x1xf32, #tpu.memory_space<vmem>>, %arg6: memref<4x16xf32, #tpu.memory_space<vmem>>, %arg7: memref<4x1xf32, #tpu.memory_space<vmem>>, %arg8: memref<4x128xf32, #tpu.memory_space<vmem>>) attributes {dimension_semantics = [#tpu.dimension_semantics<parallel>], iteration_bounds = array<i64: 1>, scalar_prefetch = 0 : i64, scratch_operands = 0 : i64, tpu.core_type = #tpu.core_type<tc>, window_params = [{transform_indices = @transform_0, window_bounds = array<i64: 8, 128>}, {pipeline_mode = #tpu.pipeline_mode<synchronous>, transform_indices = @transform_1, window_bounds = array<i64: 64, 8>}, {pipeline_mode = #tpu.pipeline_mode<synchronous>, transform_indices = @transform_2, window_bounds = array<i64: 64, 1>}, {pipeline_mode = #tpu.pipeline_mode<synchronous>, transform_indices = @transform_3, window_bounds = array<i64: 16, 64>}, {pipeline_mode = #tpu.pipeline_mode<synchronous>, transform_indices = @transform_4, window_bounds = array<i64: 16, 1>}, {pipeline_mode = #tpu.pipeline_mode<synchronous>, transform_indices = @transform_5, window_bounds = array<i64: 4, 16>}, {pipeline_mode = #tpu.pipeline_mode<synchronous>, transform_indices = @transform_6, window_bounds = array<i64: 4, 1>}, {transform_indices = @transform_7, window_bounds = array<i64: 4, 128>}]} {
    %c0 = arith.constant 0 : index
    %c0_0 = arith.constant 0 : index
    %0 = vector.load %arg1[%c0, %c0_0] : memref<8x128xf32, #tpu.memory_space<vmem>>, vector<8x128xf32>
    %c0_1 = arith.constant 0 : index
    %c0_2 = arith.constant 0 : index
    %1 = vector.load %arg2[%c0_1, %c0_2] : memref<64x8xf32, #tpu.memory_space<vmem>>, vector<64x8xf32>
    %cst = arith.constant dense<0.000000e+00> : vector<64x128xf32>
    %2 = tpu.matmul %1, %0, %cst {dimension_numbers = #tpu.dot_dimension_numbers<[1], [0], [0], [1], [0, 0, 1, 1], [], []>} : vector<64x8xf32>, vector<8x128xf32>, vector<64x128xf32> -> vector<64x128xf32>
    %c0_3 = arith.constant 0 : index
    %c0_4 = arith.constant 0 : index
    %3 = vector.load %arg3[%c0_3, %c0_4] : memref<64x1xf32, #tpu.memory_space<vmem>>, vector<64x1xf32>
    %4 = vector.broadcast %3 : vector<64x1xf32> to vector<64x128xf32>
    %5 = arith.addf %2, %4 : vector<64x128xf32>
    %cst_5 = arith.constant 0.000000e+00 : f32
    %6 = vector.broadcast %cst_5 : f32 to vector<64x128xf32>
    %7 = arith.maximumf %5, %6 : vector<64x128xf32>
    %c0_6 = arith.constant 0 : index
    %c0_7 = arith.constant 0 : index
    %8 = vector.load %arg4[%c0_6, %c0_7] : memref<16x64xf32, #tpu.memory_space<vmem>>, vector<16x64xf32>
    %cst_8 = arith.constant dense<0.000000e+00> : vector<16x128xf32>
    %9 = tpu.matmul %8, %7, %cst_8 {dimension_numbers = #tpu.dot_dimension_numbers<[1], [0], [0], [1], [0, 0, 1, 1], [], []>} : vector<16x64xf32>, vector<64x128xf32>, vector<16x128xf32> -> vector<16x128xf32>
    %c0_9 = arith.constant 0 : index
    %c0_10 = arith.constant 0 : index
    %10 = vector.load %arg5[%c0_9, %c0_10] : memref<16x1xf32, #tpu.memory_space<vmem>>, vector<16x1xf32>
    %11 = vector.broadcast %10 : vector<16x1xf32> to vector<16x128xf32>
    %12 = arith.addf %9, %11 : vector<16x128xf32>
    %cst_11 = arith.constant 0.000000e+00 : f32
    %13 = vector.broadcast %cst_11 : f32 to vector<16x128xf32>
    %14 = arith.maximumf %12, %13 : vector<16x128xf32>
    %c0_12 = arith.constant 0 : index
    %c0_13 = arith.constant 0 : index
    %15 = vector.load %arg6[%c0_12, %c0_13] : memref<4x16xf32, #tpu.memory_space<vmem>>, vector<4x16xf32>
    %cst_14 = arith.constant dense<0.000000e+00> : vector<4x128xf32>
    %16 = tpu.matmul %15, %14, %cst_14 {dimension_numbers = #tpu.dot_dimension_numbers<[1], [0], [0], [1], [0, 0, 1, 1], [], []>} : vector<4x16xf32>, vector<16x128xf32>, vector<4x128xf32> -> vector<4x128xf32>
    %c0_15 = arith.constant 0 : index
    %c0_16 = arith.constant 0 : index
    %17 = vector.load %arg7[%c0_15, %c0_16] : memref<4x1xf32, #tpu.memory_space<vmem>>, vector<4x1xf32>
    %18 = vector.broadcast %17 : vector<4x1xf32> to vector<4x128xf32>
    %19 = arith.addf %16, %18 : vector<4x128xf32>
    %cst_17 = arith.constant dense<0xFF800000> : vector<128xf32>
    %20 = vector.multi_reduction <maximumf>, %19, %cst_17 [0] : vector<4x128xf32> to vector<128xf32>
    %21 = vector.shape_cast %20 : vector<128xf32> to vector<1x128xf32>
    %22 = vector.broadcast %21 : vector<1x128xf32> to vector<4x128xf32>
    %23 = arith.subf %19, %22 : vector<4x128xf32>
    %24 = math.exp %23 : vector<4x128xf32>
    %cst_18 = arith.constant dense<0.000000e+00> : vector<128xf32>
    %25 = vector.multi_reduction <add>, %24, %cst_18 [0] : vector<4x128xf32> to vector<128xf32>
    %26 = vector.shape_cast %25 : vector<128xf32> to vector<1x128xf32>
    %27 = tpu.reciprocal %26 {approx = true} : vector<1x128xf32> -> vector<1x128xf32>
    %28 = vector.broadcast %27 : vector<1x128xf32> to vector<4x128xf32>
    %29 = arith.mulf %24, %28 : vector<4x128xf32>
    %c0_19 = arith.constant 0 : index
    %c0_20 = arith.constant 0 : index
    %30 = vector.load %arg8[%c0_19, %c0_20] : memref<4x128xf32, #tpu.memory_space<vmem>>, vector<4x128xf32>
    tpu.vector_store %arg8[%c0_19, %c0_20], %29 {strides = array<i32>} : memref<4x128xf32, #tpu.memory_space<vmem>>, vector<4x128xf32>,
    return
  }
  func.func @transform_0(%arg0: i32) -> (i32, i32) {
    %c0_i32 = arith.constant 0 : i32
    %c0_i32_0 = arith.constant 0 : i32
    return %c0_i32, %arg0 : i32, i32
  }
  func.func @transform_1(%arg0: i32) -> (i32, i32) {
    %c0_i32 = arith.constant 0 : i32
    %c0_i32_0 = arith.constant 0 : i32
    %c0_i32_1 = arith.constant 0 : i32
    return %c0_i32, %c0_i32_0 : i32, i32
  }
  func.func @transform_2(%arg0: i32) -> (i32, i32) {
    %c0_i32 = arith.constant 0 : i32
    %c0_i32_0 = arith.constant 0 : i32
    %c0_i32_1 = arith.constant 0 : i32
    return %c0_i32, %c0_i32_0 : i32, i32
  }
  func.func @transform_3(%arg0: i32) -> (i32, i32) {
    %c0_i32 = arith.constant 0 : i32
    %c0_i32_0 = arith.constant 0 : i32
    %c0_i32_1 = arith.constant 0 : i32
    return %c0_i32, %c0_i32_0 : i32, i32
  }
  func.func @transform_4(%arg0: i32) -> (i32, i32) {
    %c0_i32 = arith.constant 0 : i32
    %c0_i32_0 = arith.constant 0 : i32
    %c0_i32_1 = arith.constant 0 : i32
    return %c0_i32, %c0_i32_0 : i32, i32
  }
  func.func @transform_5(%arg0: i32) -> (i32, i32) {
    %c0_i32 = arith.constant 0 : i32
    %c0_i32_0 = arith.constant 0 : i32
    %c0_i32_1 = arith.constant 0 : i32
    return %c0_i32, %c0_i32_0 : i32, i32
  }
  func.func @transform_6(%arg0: i32) -> (i32, i32) {
    %c0_i32 = arith.constant 0 : i32
    %c0_i32_0 = arith.constant 0 : i32
    %c0_i32_1 = arith.constant 0 : i32
    return %c0_i32, %c0_i32_0 : i32, i32
  }
  func.func @transform_7(%arg0: i32) -> (i32, i32) {
    %c0_i32 = arith.constant 0 : i32
    %c0_i32_0 = arith.constant 0 : i32
    return %c0_i32, %arg0 : i32, i32
  }
}

</mosaic_0001>

<bundles_post_ra>
// kernel: tpu_custom_call.1
= control target key start
LH: loop header
LB: loop body
LE: loop exit
PB: predicated region body
PF: predicated region fallthrough
CT: control target
= control target key end

     0   :  { %vm84_vm0 = vcmask 64512   ;;  %v319_v4 = vmov 0   ;;  %s441_s0 = inlined_call_operand.vmem [shape: f32[8,128], index: 0, kind: input, shape index: {}]   ;;  %s442_s1 = inlined_call_operand.vmem [shape: f32[64,8], index: 1, kind: input, shape index: {}]   ;;  %s443_s2 = inlined_call_operand.vmem [shape: f32[64,1], index: 2, kind: input, shape index: {}]   ;;  %s444_s3 = inlined_call_operand.vmem [shape: f32[16,64], index: 3, kind: input, shape index: {}]   ;;  %s445_s4 = inlined_call_operand.vmem [shape: f32[16,1], index: 4, kind: input, shape index: {}]   ;;  %s446_s5 = inlined_call_operand.vmem [shape: f32[4,16], index: 5, kind: input, shape index: {}]   ;;  %s447_s6 = inlined_call_operand.vmem [shape: f32[4,1], index: 6, kind: input, shape index: {}]   ;;  %s448_s7 = inlined_call_operand.hbm [shape: f32[4,128], index: 7, kind: output, shape index: {}]  }
   0x1   :  { %v27_v0 = vld [vmem:[%s441_s0] sm:$0xff]  ;;  %v41_v3 = vld [vmem:[%s443_s2 + $0x28] sm:$0xff]  ;;  %287 = vset.pattern.permute.xlu1 %v319_v4  ;;  %v43_v5 = vld [vmem:[%s443_s2 + $0x38] sm:$0xff]  ;;  %286 = vset.pattern.permute.xlu0 %v319_v4 }
   0x2   :  { %v32_v1 = vld [vmem:[%s442_s1 + $0x20] sm:$0xff]  ;;  %283 = vmatpush.msra.mxu3 %v27_v0  ;;  %124 = vmatpush.msra.mxu0 %v27_v0  ;;  %v39_v6 = vld [vmem:[%s443_s2 + $0x18] sm:$0xff] }
   0x3   :  { %v28_v2 = vld [vmem:[%s442_s1] sm:$0xff]  ;;  %276 = vmatmul.msk.f32.vlgmr.msra.gmra.mxu3 %vm84_vm0, %v32_v1  ;;  %71 = vperm.xlu1 %287, %v41_v3  }
   0x4   :  { %272 = vmatmul.msk.f32.vlgmr.msra.gmra.mxu0 %vm84_vm0, %v28_v2  ;;  %288 = vset.pattern.permute.xlu2 %v319_v4 }
   0x5   :  { %81 = vperm.xlu0 %286, %v43_v5   ;;  %61 = vperm.xlu2 %288, %v39_v6  }
   0x6   :  { %12 = vsyncpa [#allocation3], 0  ;;  %v33_v7 = vld [vmem:[%s442_s1 + $0x28] sm:$0xff]  ;;  %v40_v9 = vld [vmem:[%s443_s2 + $0x20] sm:$0xff]  ;;  %vm172_vm1 = vcmask 523264   ;;  %vm211_vm2 = vcmask 130048  }
   0x7   :  { %v29_v8 = vld [vmem:[%s442_s1 + $0x8] sm:$0xff]  ;;  %v42_v10 = vld [vmem:[%s443_s2 + $0x30] sm:$0xff]  ;;  %v36_v14 = vld [vmem:[%s443_s2] sm:$0xff]  ;;  %vm235_vm3 = vcmask 1043456   ;;  %s263_s20 = sshll.u32 %s448_s7, 4  ;;  %s264_s20 = int_to_ptr.hbm [resolvable:$true] %s263_s20 }
   0x8   :  { %v38_v11 = vld [vmem:[%s443_s2 + $0x10] sm:$0xff]  ;;  %v37_v15 = vld [vmem:[%s443_s2 + $0x8] sm:$0xff]  ;;  %v35_v17 = vld [vmem:[%s442_s1 + $0x38] sm:$0xff] }
   0x9   :  { %v34_v12 = vld [vmem:[%s442_s1 + $0x30] sm:$0xff]  ;;  %v161_v16 = vld [vmem:[%s445_s4 + $0x8] sm:$0xff]  ;;  %v31_v18 = vld [vmem:[%s442_s1 + $0x18] sm:$0xff] }
   0xa   :  { %v30_v13 = vld [vmem:[%s442_s1 + $0x10] sm:$0xff]  ;;  %v205_v19 = vld [vmem:[%s447_s6] sm:$0xf]  ;;  %v159_v54 = vld [vmem:[%s444_s3 + $0x8] sm:$0xff] }
   0xb   :  { %277 = vmatmul.msk.f32.gmra.mxu3 %vm84_vm0, %v33_v7  ;;  %66 = vperm.xlu1 %287, %v40_v9   ;;  %v160_v20 = vld [vmem:[%s445_s4] sm:$0xff] }
   0xc   :  { %273 = vmatmul.msk.f32.gmra.mxu0 %vm84_vm0, %v29_v8  ;;  %v158_v53 = vld [vmem:[%s444_s3] sm:$0xff]  ;;  %s320_s3 = smov [#allocation2]  }
   0xd   :  { %76 = vperm.xlu0 %286, %v42_v10   ;;  %56 = vperm.xlu2 %288, %v38_v11   ;;  %v204_v63 = vld [vmem:[%s446_s5] sm:$0xf]  ;;  %s261_s5 = sshll.u32 %s320_s3, 4  ;;  %s262_s5 = int_to_ptr.vmem [resolvable:$true] %s261_s5 }
  0x13   :  { %278 = vmatmul.msk.f32.gmra.mxu3 %vm84_vm0, %v34_v12  ;;  %46 = vperm.xlu1 %287, %v36_v14  }
  0x14   :  { %274 = vmatmul.msk.f32.gmra.mxu0 %vm84_vm0, %v30_v13 }
  0x15   :  { %51 = vperm.xlu0 %286, %v37_v15   ;;  %169 = vperm.xlu2 %288, %v161_v16  }
  0x1b   :  { %279 = vmatmul.msk.f32.gmra.mxu3 %vm84_vm0, %v35_v17  ;;  %208 = vperm.xlu1 %287, %v205_v19  }
  0x1c   :  { %275 = vmatmul.msk.f32.gmra.mxu0 %vm84_vm0, %v31_v18 }
  0x1d   :  { %164 = vperm.xlu0 %286, %v160_v20  }
  0x5f   :  { %v62_v29 = vpop.permute.xlu2 %61 }
  0x67   :  { %v57_v42 = vpop.permute.xlu2 %56 }
  0x6f   :  { %v170_v56 = vpop.permute.xlu2 %169 }
  0x75   :  { %v72_v25 = vpop.permute.xlu1 %71 }
  0x77   :  { %v82_v26 = vpop.permute.xlu0 %81 }
  0x7d   :  { %v67_v30 = vpop.permute.xlu1 %66 }
  0x7f   :  { %v77_v31 = vpop.permute.xlu0 %76 }
  0x81   :  { %v126_v21 = vpop.f32.mrf.mxu0 }
  0x85   :  { %v47_v45 = vpop.permute.xlu1 %46 }
  0x86   :  { %v138_v22 = vpop.f32.mrf.mxu3  ;;  %v127_v49 = vadd.f32 %v126_v21, %v47_v45 }
  0x87   :  { %v139_v38 = vadd.f32 %v138_v22, %v67_v30  ;;  %v52_v46 = vpop.permute.xlu0 %51 }
  0x88   :  { %v150_v52 = vmax.f32 %v127_v49, 0.0 }
  0x89   :  { %v129_v24 = vpop.f32.mrf.mxu0  ;;  %v154_v43 = vmax.f32 %v139_v38, 0.0 }
  0x8a   :  { %v130_v47 = vadd.f32 %v129_v24, %v52_v46 }
  0x8c   :  { %v151_v51 = vmax.f32 %v130_v47, 0.0 }
  0x8d   :  { %v209_v0 = vpop.permute.xlu1 %208 }
  0x8e   :  { %v141_v23 = vpop.f32.mrf.mxu3 }
  0x8f   :  { %v142_v35 = vadd.f32 %v141_v23, %v72_v25  ;;  %v165_v57 = vpop.permute.xlu0 %164 }
  0x91   :  { %v132_v28 = vpop.f32.mrf.mxu0  ;;  %v155_v40 = vmax.f32 %v142_v35, 0.0 }
  0x92   :  { %v133_v44 = vadd.f32 %v132_v28, %v57_v42 }
  0x94   :  { %v152_v50 = vmax.f32 %v133_v44, 0.0 }
  0x96   :  { %v144_v27 = vpop.f32.mrf.mxu3 }
  0x97   :  { %v145_v33 = vadd.f32 %v144_v27, %v77_v31 }
  0x99   :  { %v135_v37 = vpop.f32.mrf.mxu0  ;;  %v156_v39 = vmax.f32 %v145_v33, 0.0 }
  0x9a   :  { %v136_v41 = vadd.f32 %v135_v37, %v62_v29 }
  0x9c   :  { %v153_v48 = vmax.f32 %v136_v41, 0.0 }
  0x9e   :  { %v147_v32 = vpop.f32.mrf.mxu3 }
  0x9f   :  { %v148_v34 = vadd.f32 %v147_v32, %v82_v26 }
  0xa1   :  { %v157_v36 = vmax.f32 %v148_v34, 0.0 }
  0xa3   :  { %187 = vmatpush.msra.mxu1 %v157_v36 }
  0xa5   :  { %188 = vmatpush.msra.mxu1 %v156_v39 }
  0xa7   :  { %189 = vmatpush.msra.mxu1 %v155_v40 }
  0xa9   :  { %190 = vmatpush.msra.mxu1 %v154_v43 }
  0xab   :  { %191 = vmatpush.msra.mxu1 %v153_v48 }
  0xad   :  { %192 = vmatpush.msra.mxu1 %v152_v50 }
  0xaf   :  { %193 = vmatpush.msra.mxu1 %v151_v51 }
  0xb1   :  { %194 = vmatpush.msra.mxu1 %v150_v52 }
  0xb2   :  { %280 = vmatmul.msk.f32.vlgmr.msra.gmra.mxu1 %vm172_vm1, %v158_v53 }
  0xba   :  { %281 = vmatmul.msk.f32.gmra.mxu1 %vm172_vm1, %v159_v54 }
 0x12f   :  { %v196_v55 = vpop.f32.mrf.mxu1 }
 0x130   :  { %v197_v59 = vadd.f32 %v196_v55, %v165_v57 }
 0x132   :  { %v202_v62 = vmax.f32 %v197_v59, 0.0 }
 0x137   :  { %v199_v58 = vpop.f32.mrf.mxu1 }
 0x138   :  { %v200_v60 = vadd.f32 %v199_v58, %v170_v56 }
 0x13a   :  { %v203_v61 = vmax.f32 %v200_v60, 0.0 }
 0x13c   :  { %229 = vmatpush.msra.mxu2 %v203_v61 }
 0x13e   :  { %230 = vmatpush.msra.mxu2 %v202_v62 }
 0x13f   :  { %282 = vmatmul.msk.f32.vlgmr.msra.gmra.mxu2 %vm211_vm2, %v204_v63 }
 0x1c2   :  { %v232_v1 = vpop.f32.mrf.mxu2 }
 0x1c3   :  { %v233_v2 = vadd.f32 %v232_v1, %v209_v0 }
 0x1c5   :  { %v236_v3 = vsel %vm235_vm3, %v233_v2, -inf }
 0x1c6   :  { %v237_v4 = vrot.slane %v236_v3, 4 }
 0x1c8   :  { %v238_v5 = vmax.f32 %v236_v3, %v237_v4 }
 0x1ca   :  { %v239_v6 = vrot.slane %v238_v5, 2 }
 0x1cc   :  { %v240_v7 = vmax.f32 %v238_v5, %v239_v6 }
 0x1ce   :  { %v241_v8 = vrot.slane %v240_v7, 1 }
 0x1d0   :  { %v242_v9 = vmax.f32 %v240_v7, %v241_v8 }
 0x1d2   :  { %v243_v10 = vsub.f32 %v233_v2, %v242_v9 }
 0x1d4   :  { %v244_v11 = vmul.f32 1.442695, %v243_v10 }
 0x1d6   :  { %289 = vpow2.f32 %v244_v11 }
 0x1dc   :  { %v290_v12 = vpop.eup %289 }
 0x1dd   :  { %v246_v13 = vsel %vm235_vm3, %v290_v12, 0.0 }
 0x1de   :  { %v247_v14 = vrot.slane %v246_v13, 4 }
 0x1e0   :  { %v248_v15 = vadd.f32 %v247_v14, %v246_v13 }
 0x1e2   :  { %v249_v16 = vrot.slane %v248_v15, 2 }
 0x1e4   :  { %v250_v17 = vadd.f32 %v249_v16, %v248_v15 }
 0x1e6   :  { %v251_v18 = vrot.slane %v250_v17, 1 }
 0x1e8   :  { %v252_v19 = vadd.f32 %v251_v18, %v250_v17 }
 0x1ea   :  { %291 = vrcp.f32 %v252_v19 }
 0x1f0   :  { %v292_v20 = vpop.eup %291 }
 0x1f1   :  { %v254_v21 = vmul.f32 %v292_v20, %v290_v12 }
 0x1f3   :  { %255 = vst [vmem:[#allocation2] sm:$0xf] %v254_v21 }
 0x1f4   :  { %266 = dma.vmem_to_hbm [thread:$0]  %s262_s5, 64, %s264_s20, [#allocation3]  }
 0x1f5   :  { %317 = dma.done.wait [#allocation3], 64  }
 0x1f6   :  { %318 = vsyncadd [#allocation3], 4294967232 }
 0x1f7   :  { %271 = vsyncpa [#allocation3], 1 }

</bundles_post_ra>
